<compile_context>
chip_gen: v7x
topology: tpu7x:2x2x1
jax: 0.10.0
libtpu: 0.0.40
codegen_flags: <defaults>
</compile_context>

<pallas_src>
import math

import jax
import jax.numpy as jnp
from jax import lax
from jax.experimental import pallas as pl
from jax.experimental.pallas import tpu as pltpu


def _cdiv(a, b):
    return (a + b - 1) // b


def _round_up(x, m):
    return ((x + m - 1) // m) * m


def _pick_tile(dim, cap, align):
    """Full (aligned) dim if it fits under `cap`; otherwise split into the
    fewest cap-sized tiles and re-balance so padding waste is at most one
    `align` group (avoids e.g. m=300 padding to 512)."""
    d = _round_up(dim, align)
    if d <= cap:
        return d
    n_tiles = _cdiv(d, cap)
    return _round_up(_cdiv(d, n_tiles), align)


def _linear_kernel(x_ref, w_ref, b_ref, o_ref, acc_ref):
    k = pl.program_id(2)

    @pl.when(k == 0)
    def _():
        acc_ref[...] = jnp.zeros_like(acc_ref)

    # x tile: (tm, tk); w tile: (tn, tk).  Contract the last dim of both
    # (i.e. x @ w.T) so the nn.Linear weight layout is fed to the MXU as-is.
    acc_ref[...] += lax.dot_general(
        x_ref[...],
        w_ref[...],
        dimension_numbers=(((1,), (1,)), ((), ())),
        preferred_element_type=jnp.float32,
    )

    @pl.when(k == pl.num_programs(2) - 1)
    def _():
        o_ref[...] = (acc_ref[...] + b_ref[...]).astype(o_ref.dtype)


def linear_forward(
    x,
    weight,
    bias=None,
    *,
    tm_cap=512,
    tn_cap=512,
    tk_cap=1024,
    use_bf16_operands=True,
):
    """nn.Linear forward: y = x @ weight.T + bias.

    weight has shape (out_dim, in_dim), exactly like torch.nn.Linear.
    x may have arbitrary leading dims; the matmul is over the last dim.
    """
    *lead, in_dim = x.shape
    out_dim = weight.shape[0]
    assert weight.shape == (out_dim, in_dim)

    m = 1
    for d in lead:
        m *= d
    out_dtype = x.dtype

    compute_dtype = (
        jnp.bfloat16
        if (use_bf16_operands and jnp.dtype(x.dtype) == jnp.dtype(jnp.float32))
        else x.dtype
    )

    x2 = x.reshape(m, in_dim)
    if bias is None:
        bias = jnp.zeros((out_dim,), jnp.float32)

    # ---------------- tile selection (VMEM-budgeted, adaptive) ----------------
    tm = _pick_tile(m, tm_cap, 8)
    tn = _pick_tile(out_dim, tn_cap, 128)

    bpe_in = jnp.dtype(compute_dtype).itemsize
    bpe_out = jnp.dtype(out_dtype).itemsize
    VMEM_BUDGET = 32 * 1024 * 1024  # fits v5e/v6e/v7x with headroom

    def vmem_use(tm_, tn_, tk_):
        # double-buffered x / w / bias inputs + double-buffered out + f32 acc
        return (
            2 * (tm_ * tk_ + tn_ * tk_) * bpe_in
            + 2 * tn_ * 4
            + 2 * tm_ * tn_ * bpe_out
            + tm_ * tn_ * 4
        )

    k_full = _round_up(in_dim, 128)
    if m <= 256 and vmem_use(tm, tn, k_full) <= VMEM_BUDGET:
        # Small-M (decode-style) fast path: no K loop, W streamed from HBM once.
        tk = k_full
    else:
        tk = _pick_tile(in_dim, tk_cap, 128)
        while vmem_use(tm, tn, tk) > VMEM_BUDGET and tk > 256:
            tk = _round_up(tk // 2, 128)
        while vmem_use(tm, tn, tk) > VMEM_BUDGET and tn > 256:
            tn = _round_up(tn // 2, 128)

    mp = _round_up(m, tm)
    np_ = _round_up(out_dim, tn)
    kp = _round_up(in_dim, tk)

    # v7x has 2 TensorCores sharded over the "parallel" grid axes; avoid a
    # 1x1 parallel grid so both cores get work (halved tile still divides the
    # padded extent, since mp == tm / np_ == tn here).
    if mp == tm and np_ == tn:
        if tn >= 256 and (tn // 2) % 128 == 0:
            tn //= 2
        elif tm >= 16 and (tm // 2) % 8 == 0:
            tm //= 2

    # -------- operand prep: pad only if ragged, cast to the MXU dtype --------
    if (mp, kp) != (m, in_dim):
        x2 = jnp.pad(x2, ((0, mp - m), (0, kp - in_dim)))
    x2 = x2.astype(compute_dtype)

    wq = weight
    if (np_, kp) != (out_dim, in_dim):
        wq = jnp.pad(wq, ((0, np_ - out_dim), (0, kp - in_dim)))
    wq = wq.astype(compute_dtype)

    b2 = bias.astype(jnp.float32)
    if np_ != out_dim:
        b2 = jnp.pad(b2, (0, np_ - out_dim))
    b2 = b2.reshape(1, np_)

    grid = (mp // tm, np_ // tn, kp // tk)

    cost = pl.CostEstimate(
        flops=2 * m * out_dim * in_dim,
        transcendentals=0,
        bytes_accessed=(
            m * in_dim * bpe_in
            + out_dim * in_dim * bpe_in
            + out_dim * 4
            + m * out_dim * bpe_out
        ),
    )

    out = pl.pallas_call(
        _linear_kernel,
        out_shape=jax.ShapeDtypeStruct((mp, np_), out_dtype),
        grid_spec=pltpu.PrefetchScalarGridSpec(
            num_scalar_prefetch=0,
            grid=grid,
            in_specs=[
                pl.BlockSpec((tm, tk), lambda i, j, k: (i, k)),
                pl.BlockSpec((tn, tk), lambda i, j, k: (j, k)),
                pl.BlockSpec((1, tn), lambda i, j, k: (0, j)),
            ],
            out_specs=pl.BlockSpec((tm, tn), lambda i, j, k: (i, j)),
            scratch_shapes=[pltpu.VMEM((tm, tn), jnp.float32)],
        ),
        compiler_params=pltpu.CompilerParams(
            dimension_semantics=("parallel", "parallel", "arbitrary"),
            vmem_limit_bytes=48 * 1024 * 1024,
        ),
        cost_estimate=cost,
    )(x2, wq, b2)

    y = out[:m, :out_dim]
    return y.reshape(*lead, out_dim)


if __name__ == "__main__":
    key = jax.random.PRNGKey(0)
    k_x, k_w, k_b = jax.random.split(key, 3)

    # Small shapes implied by the module: batch=2, seq=8, in_dim=32, out_dim=64.
    batch, seq, in_dim, out_dim = 2, 8, 32, 64
    x = jax.random.normal(k_x, (batch, seq, in_dim), jnp.float32)

    # xavier_uniform_(weight, gain=calculate_gain('linear') = 1.0)
    bound_w = math.sqrt(6.0 / (in_dim + out_dim))
    weight = jax.random.uniform(
        k_w, (out_dim, in_dim), jnp.float32, -bound_w, bound_w
    )
    # nn.Linear default bias init: U(-1/sqrt(fan_in), 1/sqrt(fan_in))
    bound_b = 1.0 / math.sqrt(in_dim)
    bias = jax.random.uniform(k_b, (out_dim,), jnp.float32, -bound_b, bound_b)

    y = linear_forward(x, weight, bias)
    y = jax.block_until_ready(y)
    assert y.shape == (batch, seq, out_dim), y.shape

    # Tight check against the same bf16-rounded operands (isolates kernel
    # correctness from the bf16 operand cast; accumulation is f32 in both).
    xb = x.astype(jnp.bfloat16).astype(jnp.float32)
    wb = weight.astype(jnp.bfloat16).astype(jnp.float32)
    ref_bf16 = xb @ wb.T + bias
    assert jnp.allclose(y, ref_bf16, rtol=1e-4, atol=1e-4), float(
        jnp.max(jnp.abs(y - ref_bf16))
    )

    # Loose sanity check against the exact f32 nn.Linear reference (bf16 MXU
    # operands with f32 accumulation -> small, bounded error).
    ref_f32 = x @ weight.T + bias
    assert jnp.allclose(y, ref_f32, rtol=3e-2, atol=3e-2), float(
        jnp.max(jnp.abs(y - ref_f32))
    )

    print("KERNEL_OK")
</pallas_src>

<mosaic_0001>
module attributes {stable_mosaic.version = 11 : i64} {
  func.func @_linear_kernel(%arg0: i32, %arg1: i32, %arg2: i32, %arg3: memref<8x128xbf16, #tpu.memory_space<vmem>>, %arg4: memref<128x128xbf16, #tpu.memory_space<vmem>>, %arg5: memref<1x128xf32, #tpu.memory_space<vmem>>, %arg6: memref<8x128xf32, #tpu.memory_space<vmem>>, %arg7: memref<8x128xf32, #tpu.memory_space<vmem>>) attributes {dimension_semantics = [#tpu.dimension_semantics<parallel>, #tpu.dimension_semantics<parallel>, #tpu.dimension_semantics<arbitrary>], iteration_bounds = array<i64: 2, 1, 1>, scalar_prefetch = 0 : i64, scratch_operands = 1 : i64, tpu.core_type = #tpu.core_type<tc>, window_params = [{transform_indices = @transform_0, window_bounds = array<i64: 8, 128>}, {transform_indices = @transform_1, window_bounds = array<i64: 128, 128>}, {transform_indices = @transform_2, window_bounds = array<i64: 1, 128>}, {transform_indices = @transform_3, window_bounds = array<i64: 8, 128>}]} {
    %c0_i32 = arith.constant 0 : i32
    %0 = arith.cmpi eq, %arg2, %c0_i32 : i32
    %1 = arith.extui %0 : i1 to i32
    %c0_i32_0 = arith.constant 0 : i32
    %2 = arith.cmpi ne, %1, %c0_i32_0 : i32
    scf.if %2 {
      %cst_10 = arith.constant 0.000000e+00 : f32
      %12 = vector.broadcast %cst_10 : f32 to vector<8x128xf32>
      %c0_11 = arith.constant 0 : index
      %c0_12 = arith.constant 0 : index
      %13 = vector.load %arg7[%c0_11, %c0_12] : memref<8x128xf32, #tpu.memory_space<vmem>>, vector<8x128xf32>
      tpu.vector_store %arg7[%c0_11, %c0_12], %12 {strides = array<i32>} : memref<8x128xf32, #tpu.memory_space<vmem>>, vector<8x128xf32>,
    } else {
    }
    %c0 = arith.constant 0 : index
    %c0_1 = arith.constant 0 : index
    %3 = vector.load %arg7[%c0, %c0_1] : memref<8x128xf32, #tpu.memory_space<vmem>>, vector<8x128xf32>
    %c0_2 = arith.constant 0 : index
    %c0_3 = arith.constant 0 : index
    %4 = vector.load %arg3[%c0_2, %c0_3] : memref<8x128xbf16, #tpu.memory_space<vmem>>, vector<8x128xbf16>
    %c0_4 = arith.constant 0 : index
    %c0_5 = arith.constant 0 : index
    %5 = vector.load %arg4[%c0_4, %c0_5] : memref<128x128xbf16, #tpu.memory_space<vmem>>, vector<128x128xbf16>
    %cst = arith.constant dense<0.000000e+00> : vector<8x128xf32>
    %6 = tpu.matmul %4, %5, %cst {dimension_numbers = #tpu.dot_dimension_numbers<[1], [1], [0], [0], [0, 0, 1, 0], [], []>} : vector<8x128xbf16>, vector<128x128xbf16>, vector<8x128xf32> -> vector<8x128xf32>
    %7 = arith.addf %3, %6 : vector<8x128xf32>
    %c0_6 = arith.constant 0 : index
    %c0_7 = arith.constant 0 : index
    %8 = vector.load %arg7[%c0_6, %c0_7] : memref<8x128xf32, #tpu.memory_space<vmem>>, vector<8x128xf32>
    tpu.vector_store %arg7[%c0_6, %c0_7], %7 {strides = array<i32>} : memref<8x128xf32, #tpu.memory_space<vmem>>, vector<8x128xf32>,
    %c0_i32_8 = arith.constant 0 : i32
    %9 = arith.cmpi eq, %arg2, %c0_i32_8 : i32
    %10 = arith.extui %9 : i1 to i32
    %c0_i32_9 = arith.constant 0 : i32
    %11 = arith.cmpi ne, %10, %c0_i32_9 : i32
    scf.if %11 {
      %c0_10 = arith.constant 0 : index
      %c0_11 = arith.constant 0 : index
      %12 = vector.load %arg7[%c0_10, %c0_11] : memref<8x128xf32, #tpu.memory_space<vmem>>, vector<8x128xf32>
      %c0_12 = arith.constant 0 : index
      %c0_13 = arith.constant 0 : index
      %13 = vector.load %arg5[%c0_12, %c0_13] : memref<1x128xf32, #tpu.memory_space<vmem>>, vector<1x128xf32>
      %14 = vector.broadcast %13 : vector<1x128xf32> to vector<8x128xf32>
      %15 = arith.addf %12, %14 : vector<8x128xf32>
      %c0_14 = arith.constant 0 : index
      %c0_15 = arith.constant 0 : index
      %16 = vector.load %arg6[%c0_14, %c0_15] : memref<8x128xf32, #tpu.memory_space<vmem>>, vector<8x128xf32>
      tpu.vector_store %arg6[%c0_14, %c0_15], %15 {strides = array<i32>} : memref<8x128xf32, #tpu.memory_space<vmem>>, vector<8x128xf32>,
    } else {
    }
    return
  }
  func.func @transform_0(%arg0: i32, %arg1: i32, %arg2: i32) -> (i32, i32) {
    %c0_i32 = arith.constant 0 : i32
    return %arg0, %arg2 : i32, i32
  }
  func.func @transform_1(%arg0: i32, %arg1: i32, %arg2: i32) -> (i32, i32) {
    %c0_i32 = arith.constant 0 : i32
    return %arg1, %arg2 : i32, i32
  }
  func.func @transform_2(%arg0: i32, %arg1: i32, %arg2: i32) -> (i32, i32) {
    %c0_i32 = arith.constant 0 : i32
    %c0_i32_0 = arith.constant 0 : i32
    return %c0_i32, %arg1 : i32, i32
  }
  func.func @transform_3(%arg0: i32, %arg1: i32, %arg2: i32) -> (i32, i32) {
    %c0_i32 = arith.constant 0 : i32
    return %arg0, %arg1 : i32, i32
  }
}

</mosaic_0001>

<bundles_post_ra>
// kernel: tpu_custom_call.1
= control target key start
LH: loop header
LB: loop body
LE: loop exit
PB: predicated region body
PF: predicated region fallthrough
CT: control target
= control target key end

     0   :  { %8 = vsyncpa [#allocation4], 0  ;;  %s1035_s0 = inlined_call_operand.hbm [shape: bf16[16,128], index: 0, kind: input, shape index: {}]   ;;  %s1036_s1 = inlined_call_operand.hbm [shape: bf16[128,128], index: 1, kind: input, shape index: {}]   ;;  %s1037_s2 = inlined_call_operand.vmem [shape: f32[1,128], index: 2, kind: input, shape index: {}]   ;;  %s1038_s3 = inlined_call_operand.hbm [shape: f32[16,128], index: 3, kind: output, shape index: {}]  }
   0x1   :  { %10 = vsyncpa [#allocation4 + $0x1], 0 }
   0x2   :  { %11 = vsyncpa [#allocation7], 0 }
   0x3   :  { %12 = vsyncpa [#allocation5], 0 }
   0x4   :  { %14 = vsyncpa [#allocation5 + $0x1], 0  ;;  %s814_s12 = smov 0   ;;  %s816_s13 = smov 0  }
   0x5   :  { %s818_s14 = smov 0   ;;  %s820_s15 = smov 0  }
   0x6   :  { %s822_s16 = smov 0   ;;  %s824_s17 = smov 0  }
   0x7 LB: > { %s502_s18 = sadd.s32 4294967295, %s785_s17   ;;  %s503_s19 = sadd.s32 4294967294, %s785_s17   ;;  %s785_s17 = sphi %s824_s17, %s20_s17   ;;  %s781_s16 = sphi %s822_s16, %s1062_s16   ;;  %s777_s15 = sphi %s820_s15, %s1061_s15   ;;  %s773_s14 = sphi %s818_s14, %s1060_s14   ;;  %s769_s13 = sphi %s816_s13, %s1059_s13   ;;  %s765_s12 = sphi %s814_s12, %s1058_s12  }
   0x8   : > { %p61_p0 = scmp.ne.s32.totalorder %s769_s13, %s765_s12  ;;  %p848_p1 = scmp.eq.s32.totalorder %s502_s18, 0 }
   0x9   : > { %p852_p2 = scmp.eq.s32.totalorder %s502_s18, 1  ;;  %p147_p3 = scmp.eq.s32.totalorder %s503_s19, 1 }
   0xa   : > { %s1043_s20 = scalar_select %p848_p1, 1, 0 }
   0xb   : > { %s1044_s21 = scalar_select %p852_p2, 1, 0 }
   0xc   : > { %p858_p4 = por %p848_p1, %p61_p0  ;;  %p504_p5 = scmp.ge.s32.totalorder %s785_s17, 1 }
   0xd   : > { %p863_p6 = por %p147_p3, %p61_p0  ;;  %p154_p7 = scmp.lt.s32.totalorder %s785_s17, 3 }
   0xe   : > { %s1045_s22 = scalar_select %p858_p4, 1, 0 }
   0xf   : > { %s1046_s23 = scalar_select %p863_p6, 1, 0 }
  0x10   : > { %p868_p8 = pnand %p504_p5, %p154_p7  ;;  %s787_s25 = smov [#allocation6]  }
  0x11   : > { %s170_s26 = sshll.u32 %s787_s25, 4  ;;  %s39_s28 = sadd.s32 1, %s781_s16  ;;  %s171_s26 = int_to_ptr.vmem [resolvable:$true] %s170_s26 }
  0x12   : > { %s1047_s24 = scalar_select %p868_p8, 1, 0 }
  0x13   : > { %p564_p9 = pneg %p868_p8  ;;  %s641_s4 = scalar_lea.hbm %s1036_s1, 1024 }
  0x14   : > { %p642_p12 = scmp.ne.s32.totalorder %s1036_s1, %s641_s4  ;;  %p648_p5 = scmp.lt.u32.totalorder %s641_s4, %s1036_s1 }
  0x15   : > { %p877_p11 = pnand %p564_p9, %p848_p1 }
  0x17   : > { %p643_p13 = pneg %p877_p11 }
  0x19   : > { %p644_p0 = pnand %p643_p13, %p642_p12 }
  0x1b   : > { %p645_p3 = pneg %p644_p0 }
  0x1d   : > { %p650_p7 = pnand %p648_p5, %p645_p3 }
  0x1f   : > { %653 = shalt.err (!%p650_p7)
}
  0x20   : > { %s654_s9 = scalar_lea.vmem %s171_s26, 1024  ;;  %p662_p1 = scmp.lt.s32.totalorder %s171_s26, %s171_s26 }
  0x21   : > { %p655_p9 = scmp.ne.s32.totalorder %s171_s26, %s654_s9  ;;  %p663_p4 = scmp.lt.s32.totalorder %s654_s9, %s654_s9 }
  0x23   : > { %p657_p10 = pnand %p655_p9, %p643_p13  ;;  %p664_p8 = por %p663_p4, %p662_p1 }
  0x25   : > { %p658_p6 = pneg %p657_p10 }
  0x27   : > { %p665_p2 = pnand %p664_p8, %p658_p6 }
  0x29   : > { %668 = shalt.err (!%p665_p2)
}
  0x2a   : > { %s788_s10 = smov 64   ;;  %s789_s11 = smov 4  }
  0x2b   : > { %567 = dma.hbm_to_vmem [thread:$0]  (!%p877_p11), %s1036_s1, 1024, %s171_s26, [#allocation7], %s788_s10, %s788_s10, %s789_s11  }
  0x2c   : > { %p41_p1 = scmp.ge.s32.totalorder %s39_s28, 2  ;;  %s48_s25 = sadd.s32 1, %s773_s14 }
  0x2d   : > { %p55_p2 = scmp.ne.s32.totalorder %s773_s14, %s769_s13  ;;  %p56_p4 = scmp.eq.s32.totalorder %s785_s17, 0 }
  0x2e   : > { %s1064_s28 = smov (%p41_p1, %s39_s28), 0  ;;  %p1050_p8 = scmp.ne.s32.totalorder %s1044_s21, 0 }
  0x2f   : > { %p904_p6 = por %p56_p4, %p55_p2  ;;  %s43_s27 = ssub.s32 %s781_s16, %s1064_s28 }
  0x30   : > { %p910_p10 = por %p1050_p8, %p55_p2  ;;  %p577_p12 = scmp.lt.s32.totalorder %s785_s17, 2 }
  0x31   : > { %p46_p11 = scmp.eq.s32.totalorder %s43_s27, 0  ;;  %s190_s26 = sand.u32 1, %s773_s14  }
  0x32   : > { %s508_s4 = sshll.u32 %s190_s26, 2  ;;  %s509_s6 = sshll.u32 %s781_s16, 6 }
  0x33   : > { %s919_s5 = scalar_select %p46_p11, %s773_s14, %s48_s25  }
  0x34   : > { %s925_s9 = scalar_lea.hbm %s1035_s0, %s509_s6  ;;  %s194_s21 = scalar_lea.vmem [#allocation3], %s508_s4 }
  0x35   : > { %s202_s10 = sshll.u32 %s194_s21, 4  ;;  %p931_p13 = pnand %p577_p12, %p904_p6  ;;  %s927_s10 = int_to_ptr.vmem [resolvable:$true] %s202_s10 }
  0x36   : > { %s191_s18 = scalar_lea.sflag [#allocation4], %s190_s26  ;;  %s669_s19 = scalar_lea.hbm %s925_s9, 64 }
  0x37   : > { %p670_p0 = scmp.ne.s32.totalorder %s925_s9, %s669_s19  ;;  %p671_p3 = pneg %p931_p13 }
  0x38   : > { %s674_s4 = scalar_lea.hbm %s1035_s0, 128  ;;  %p675_p9 = scmp.lt.u32.totalorder %s925_s9, %s1035_s0 }
  0x39   : > { %p672_p5 = pnand %p671_p3, %p670_p0  ;;  %p676_p1 = scmp.lt.u32.totalorder %s674_s4, %s669_s19 }
  0x3a   : > { %p678_p4 = scmp.lt.u32.totalorder %s669_s19, %s925_s9 }
  0x3b   : > { %p673_p7 = pneg %p672_p5  ;;  %p677_p2 = por %p676_p1, %p675_p9 }
  0x3d   : > { %p679_p6 = por %p678_p4, %p677_p2 }
  0x3f   : > { %p680_p8 = pnand %p679_p6, %p673_p7 }
  0x41   : > { %683 = shalt.err (!%p680_p8)
}
  0x42   : > { %s684_s26 = scalar_lea.vmem %s927_s10, 64  ;;  %s790_s7 = smov [#allocation3]  }
  0x43   : > { %p685_p12 = scmp.ne.s32.totalorder %s927_s10, %s684_s26  ;;  %s689_s8 = sshll.u32 %s790_s7, 4  ;;  %s690_s8 = int_to_ptr.vmem [resolvable:$false] %s689_s8 }
  0x44   : > { %s691_s21 = scalar_lea.vmem %s690_s8, 128  ;;  %p692_p5 = scmp.lt.s32.totalorder %s927_s10, %s690_s8 }
  0x45   : > { %p687_p11 = pnand %p685_p12, %p671_p3  ;;  %p693_p9 = scmp.lt.s32.totalorder %s691_s21, %s684_s26 }
  0x47   : > { %p688_p0 = pneg %p687_p11  ;;  %p694_p1 = por %p693_p9, %p692_p5 }
  0x49   : > { %p695_p2 = pnand %p694_p1, %p688_p0 }
  0x4b   : > { %698 = shalt.err (!%p695_p2)
}
  0x4c   : > { %571 = dma.hbm_to_vmem [thread:$0]  (!%p931_p13), %s925_s9, 64, %s927_s10, %s191_s18  }
  0x4d   : > { %p1053_p7 = scmp.ne.s32.totalorder %s1047_s24, 0 }
  0x4e   : > { %s963_s19 = sand.u32 (!%p1053_p7), 1, %s769_s13   ;;  %p1054_p3 = scmp.ne.s32.totalorder (!%p1053_p7), %s1045_s22, 0 }
  0x4f   : > { %211 = sbr.rel (%p1053_p7) target bundleno = 383 (0x17f), region = 32  ;;  %s511_s25 = sshll.u32 (!%p1053_p7), %s963_s19, 2 }
  0x50   : > { %s214_s27 = scalar_lea.sflag (!%p1053_p7), [#allocation4], %s963_s19  ;;  %s967_s4 = scalar_lea.vmem (!%p1053_p7), [#allocation3], %s511_s25 }
  0x56   : > { %752 = dma.done.wait (%p1054_p3), %s214_s27, 64  }
  0x57   : > { %754 = vsyncadd (%p1054_p3), %s214_s27, 4294967232  ;;  %p1055_p13 = scmp.ne.s32.totalorder %s1043_s20, 0 }
  0x59   : > { %756 = dma.done.wait (%p1055_p13), [#allocation7], 1024  }
  0x5a   : > { %758 = vsyncadd (%p1055_p13), [#allocation7], 4294966272  ;;  %v791_v0 = vmov 0.0   ;;  %vm792_vm0 = vmmov 0   ;;  %v633_v1 = vld [vmem:[#allocation6] sm:$0xff]   ;;  %v634_v2 = vld [vmem:[#allocation6 + $0x8] sm:$0xff]  }
  0x5b   : > { %536 = vmatprep.subr.bf16.mxu0 %v791_v0  ;;  %552 = vmatprep.mubr.msk.bf16.mxu0 %vm792_vm0, %v791_v0  ;;  %v635_v3 = vld [vmem:[#allocation6 + $0x10] sm:$0xff]   ;;  %v636_v4 = vld [vmem:[#allocation6 + $0x18] sm:$0xff]   ;;  %v637_v5 = vld [vmem:[#allocation6 + $0x20] sm:$0xff]   ;;  %s513_s20 = sshll.u32 %s963_s19, 3  ;;  %s524_s9 = sshll.u32 %s777_s15, 7 }
  0x5c   : > { %537 = vmatpush3.bf16.xpose.msra.mxu0 %v633_v1  ;;  %v638_v6 = vld [vmem:[#allocation6 + $0x28] sm:$0xff]   ;;  %v639_v7 = vld [vmem:[#allocation6 + $0x30] sm:$0xff]   ;;  %v640_v8 = vld [vmem:[#allocation6 + $0x38] sm:$0xff]   ;;  %s246_s10 = scalar_lea.vmem [#allocation8], %s513_s20  ;;  %s986_s6 = scalar_lea.hbm %s1038_s3, %s524_s9 }
  0x5d   : > { %538 = vmatprep.subr.bf16.mxu0 %v791_v0  ;;  %v258_v9 = vld [vmem:[%s967_s4] sm:$0xf]  ;;  %s393_s11 = sshll.u32 %s246_s10, 4  ;;  %s379_s26 = scalar_lea.sflag [#allocation5], %s963_s19  ;;  %s988_s11 = int_to_ptr.vmem [resolvable:$true] %s393_s11 }
  0x5e   : > { %v522_v10 = vld [vmem:[%s1037_s2] ss:$0 sm:$0xff]  ;;  %s699_s15 = scalar_lea.vmem %s988_s11, 128  ;;  %s793_s7 = smov [#allocation8]  }
  0x5f   : > { %p700_p4 = scmp.ne.s32.totalorder %s988_s11, %s699_s15  ;;  %s703_s8 = sshll.u32 %s793_s7, 4  ;;  %s704_s8 = int_to_ptr.vmem [resolvable:$false] %s703_s8 }
  0x60   : > { %s705_s21 = scalar_lea.vmem %s704_s8, 256  ;;  %p706_p12 = scmp.lt.s32.totalorder %s988_s11, %s704_s8 }
  0x61   : > { %p701_p6 = pnand %p700_p4, %p910_p10  ;;  %p707_p11 = scmp.lt.s32.totalorder %s705_s21, %s699_s15 }
  0x63   : > { %p702_p8 = pneg %p701_p6  ;;  %p708_p0 = por %p707_p11, %p706_p12 }
  0x64   : > { %539 = vmatpush3.bf16.xpose.msra.mxu0 %v634_v2 }
  0x65   : > { %540 = vmatprep.subr.bf16.mxu0 %v791_v0  ;;  %p709_p5 = pnand %p708_p0, %p702_p8 }
  0x6c   : > { %541 = vmatpush3.bf16.xpose.msra.mxu0 %v635_v3 }
  0x6d   : > { %542 = vmatprep.subr.bf16.mxu0 %v791_v0 }
  0x74   : > { %543 = vmatpush3.bf16.xpose.msra.mxu0 %v636_v4 }
  0x75   : > { %544 = vmatprep.subr.bf16.mxu0 %v791_v0 }
  0x7c   : > { %545 = vmatpush3.bf16.xpose.msra.mxu0 %v637_v5 }
  0x7d   : > { %546 = vmatprep.subr.bf16.mxu0 %v791_v0 }
  0x84   : > { %547 = vmatpush3.bf16.xpose.msra.mxu0 %v638_v6 }
  0x85   : > { %548 = vmatprep.subr.bf16.mxu0 %v791_v0 }
  0x8c   : > { %549 = vmatpush3.bf16.xpose.msra.mxu0 %v639_v7 }
  0x8d   : > { %550 = vmatprep.subr.bf16.mxu0 %v791_v0 }
  0x94   : > { %551 = vmatpush3.bf16.xpose.msra.mxu0 %v640_v8 }
  0x9b   : > { %553 = vmatmul.mubr.bf16.vlgmr.msra.gmra.mrb[0].mxu0 %v258_v9 }
 0x16e   : > { %v357_v11 = vpop.f32.mrb[0].mxu0 }
 0x16f   : > { %v376_v12 = vadd.f32 %v522_v10, %v357_v11  ;;  %v554_v13 = vpop.f32.mrb[1].mxu0 }
 0x170   : > { %v360_v14 = vpop.f32.mrb[2].mxu0 }
 0x171   : > { %377 = vst [vmem:[%s246_s10] sm:$0xff] %v376_v12  ;;  %v555_v15 = vpop.f32.mrb[3].mxu0 }
 0x172   : > { %712 = shalt.err (!%p709_p5)
}
 0x173   : > { %s713_s19 = scalar_lea.hbm %s986_s6, 128  ;;  %s717_s4 = scalar_lea.hbm %s1038_s3, 256 }
 0x174   : > { %p714_p9 = scmp.ne.s32.totalorder %s986_s6, %s713_s19  ;;  %p718_p7 = scmp.lt.u32.totalorder %s986_s6, %s1038_s3 }
 0x175   : > { %p719_p3 = scmp.lt.u32.totalorder %s717_s4, %s713_s19  ;;  %p721_p4 = scmp.lt.u32.totalorder %s713_s19, %s986_s6 }
 0x176   : > { %p715_p1 = pnand %p714_p9, %p910_p10 }
 0x177   : > { %p720_p13 = por %p719_p3, %p718_p7 }
 0x178   : > { %p716_p2 = pneg %p715_p1 }
 0x179   : > { %p722_p6 = por %p721_p4, %p720_p13 }
 0x17b   : > { %p723_p8 = pnand %p722_p6, %p716_p2 }
 0x17d   : > { %726 = shalt.err (!%p723_p8)
}
 0x17e   : > { %562 = dma.vmem_to_hbm [thread:$0]  (%p910_p10), %s988_s11, 128, %s986_s6, %s379_s26  }
 0x17f PF: > { %s405_s24 = sand.u32 1, %s765_s12   ;;  %p1056_p12 = scmp.ne.s32.totalorder %s1046_s23, 0 }
 0x180   : > { %p1057_p11 = scmp.ge.s32.totalorder %s785_s17, 2  ;;  %s406_s9 = scalar_lea.sflag [#allocation5], %s405_s24 }
 0x182   : > { %p573_p0 = pnand %p1057_p11, %p1056_p12 }
 0x184   : > { %760 = dma.done.wait (!%p573_p0), %s406_s9, 128  }
 0x185   : > { %762 = vsyncadd (!%p573_p0), %s406_s9, 4294967168  ;;  %s20_s17 = sadd.s32 1, %s785_s17   ;;  %s1058_s12 = smov %s769_s13 }
 0x186   : > { %p17_p5 = scmp.ge.s32.totalorder %s20_s17, 4   ;;  %s1059_s13 = smov %s773_s14 }
 0x187   : > { %s1060_s14 = smov %s919_s5  ;;  %s1061_s15 = smov %s781_s16 }
 0x188   : > { %s1062_s16 = smov %s1064_s28  ;;  %19 = sbr.rel (!%p17_p5) target bundleno = 7 (0x7), region = 93 }
 0x18f   :  { %411 = vsyncpa [#allocation4], 1 }
 0x190   :  { %413 = vsyncpa [#allocation4 + $0x1], 1 }
 0x191   :  { %414 = vsyncpa [#allocation7], 1 }
 0x192   :  { %415 = vsyncpa [#allocation5], 1 }
 0x193   :  { %417 = vsyncpa [#allocation5 + $0x1], 1 }

</bundles_post_ra>
